<compile_context>
chip_gen: v7x
topology: tpu7x:2x2x1
jax: 0.10.0
libtpu: 0.0.40
codegen_flags: <defaults>
</compile_context>

<pallas_src>
import functools

import jax
import jax.numpy as jnp
from jax import lax
from jax.experimental import pallas as pl
from jax.experimental.pallas import tpu as pltpu

_LANE = 128
_SUBLANE = 8
_NEG_PAD = -1e30  # effectively -inf for max / exp, but finite (no inf-inf NaNs)


def _round_up(x: int, m: int) -> int:
    return ((x + m - 1) // m) * m


def _choose_row_tile(c_padded: int, itemsize: int) -> int:
    """Pick a row-tile that keeps double-buffered inputs + f32 temps well under VMEM."""
    # ~ 2 double-buffered native-dtype input copies + a few f32-sized compute temps.
    bytes_per_row = c_padded * (2 * itemsize + 3 * 4)
    budget = 24 * 1024 * 1024  # conservative: fits v7x's 64 MiB VMEM with headroom
    tn = budget // max(bytes_per_row, 1)
    tn = max(_SUBLANE, min(512, (tn // _SUBLANE) * _SUBLANE))
    return tn


def _generator_loss_tile_kernel(logits_ref, tgt_ref, out_ref, *, num_classes):
    # logits_ref: (TN, Cp) native dtype, tgt_ref: (TN, 1) int32, out_ref: (1, 1, 128) f32
    logits = logits_ref[...].astype(jnp.float32)          # in-register upcast
    tn, cp = logits.shape
    tgt = tgt_ref[...]                                     # (TN, 1) int32

    # valid rows: in-range targets (PyTorch ignore_index=-100 and row padding -> invalid)
    valid = jnp.logical_and(tgt >= 0, tgt < num_classes)   # (TN, 1) bool

    # fused log-softmax + gather:
    #   -log_softmax(logits)[i, t_i] = m_i + log(sum exp(logits_i - m_i)) - logits[i, t_i]
    m = jnp.max(logits, axis=-1, keepdims=True)                                  # (TN, 1)
    lse = jnp.log(jnp.sum(jnp.exp(logits - m), axis=-1, keepdims=True))          # (TN, 1)

    col_ids = lax.broadcasted_iota(jnp.int32, (tn, cp), 1)                       # (TN, Cp)
    picked = jnp.sum(jnp.where(col_ids == tgt, logits, 0.0), axis=-1,
                     keepdims=True)                                              # (TN, 1)

    per_row = jnp.where(valid, m + lse - picked, 0.0)                            # (TN, 1)
    tile_sum = jnp.sum(per_row)                                                  # scalar

    # lane-dense partial-sum block; written exactly once per grid step
    out_ref[...] = jnp.zeros((1, 1, _LANE), jnp.float32) + tile_sum


def generator_loss(mlm_logits: jax.Array, mlm_tgts: jax.Array,
                   row_tile: int | None = None) -> jax.Array:
    """mlm_logits: (..., C) float, mlm_tgts: (...) int -> scalar mean NLL loss."""
    c = mlm_logits.shape[-1]
    logits2d = mlm_logits.reshape(-1, c)                    # keep native dtype
    tgts1d = mlm_tgts.reshape(-1).astype(jnp.int32)
    n = logits2d.shape[0]

    # pad class dim to a lane-dense multiple of 128 with a large negative constant
    cp = _round_up(c, _LANE)
    if cp != c:
        logits2d = jnp.pad(logits2d, ((0, 0), (0, cp - c)), constant_values=_NEG_PAD)

    # pick the row tile (per-generation VMEM-aware) and pad rows to a multiple of it
    itemsize = jnp.dtype(logits2d.dtype).itemsize
    tn = _choose_row_tile(cp, itemsize) if row_tile is None else max(
        _SUBLANE, (int(row_tile) // _SUBLANE) * _SUBLANE)
    tn = min(tn, _round_up(n, _SUBLANE))
    n_pad = _round_up(n, tn)
    if n_pad != n:
        logits2d = jnp.pad(logits2d, ((0, n_pad - n), (0, 0)))
        tgts_p = jnp.pad(tgts1d, (0, n_pad - n), constant_values=-100)
    else:
        tgts_p = tgts1d
    tgts2d = tgts_p.reshape(-1, 1)
    num_tiles = n_pad // tn

    partials = pl.pallas_call(
        functools.partial(_generator_loss_tile_kernel, num_classes=c),
        out_shape=jax.ShapeDtypeStruct((num_tiles, 1, _LANE), jnp.float32),
        grid=(num_tiles,),
        in_specs=[
            pl.BlockSpec((tn, cp), lambda i: (i, 0)),
            pl.BlockSpec((tn, 1), lambda i: (i, 0)),
        ],
        out_specs=pl.BlockSpec((1, 1, _LANE), lambda i: (i, 0, 0)),
        compiler_params=pltpu.CompilerParams(
            dimension_semantics=("parallel",),
            vmem_limit_bytes=48 * 1024 * 1024,
        ),
    )(logits2d, tgts2d)

    total = jnp.sum(partials[:, 0, 0])
    # valid-target count (PyTorch NLLLoss mean is over non-ignored targets);
    # computed on the tiny targets array in plain JAX.
    valid = jnp.logical_and(tgts1d >= 0, tgts1d < c)
    cnt = jnp.maximum(jnp.sum(valid).astype(jnp.float32), 1.0)
    return total / cnt


def _ref_loss(logits, tgts, ignore_index=-100):
    """Plain-JAX reference: LogSoftmax + NLLLoss(mean, ignore_index)."""
    c = logits.shape[-1]
    logits2d = logits.reshape(-1, c).astype(jnp.float32)
    t = tgts.reshape(-1)
    valid = jnp.logical_and(t != ignore_index, jnp.logical_and(t >= 0, t < c))
    safe_t = jnp.where(valid, t, 0)
    logp = jax.nn.log_softmax(logits2d, axis=-1)
    picked = jnp.take_along_axis(logp, safe_t[:, None], axis=-1)[:, 0]
    num = -jnp.sum(jnp.where(valid, picked, 0.0))
    den = jnp.maximum(jnp.sum(valid).astype(jnp.float32), 1.0)
    return num / den


if __name__ == "__main__":
    key = jax.random.PRNGKey(0)
    batch, seq, vocab = 4, 24, 200          # small MLM-style shapes; vocab not 128-aligned
    k1, k2 = jax.random.split(key)
    mlm_logits = jax.random.normal(k1, (batch, seq, vocab), dtype=jnp.float32)
    mlm_tgts = jax.random.randint(k2, (batch, seq), 0, vocab, dtype=jnp.int32)
    # a few ignored positions (PyTorch NLLLoss default ignore_index=-100)
    mlm_tgts = mlm_tgts.at[0, :3].set(-100)

    ref = _ref_loss(mlm_logits, mlm_tgts)

    # multi-tile path (exercises the row grid + class-dim padding)
    loss = generator_loss(mlm_logits, mlm_tgts, row_tile=32)
    jax.block_until_ready(loss)
    assert jnp.allclose(loss, ref, atol=2e-5, rtol=1e-5), (loss, ref)

    # default (auto) tile path
    loss2 = generator_loss(mlm_logits, mlm_tgts)
    jax.block_until_ready(loss2)
    assert jnp.allclose(loss2, ref, atol=2e-5, rtol=1e-5), (loss2, ref)

    print("KERNEL_OK")
</pallas_src>

<mosaic_0001>
module attributes {stable_mosaic.version = 11 : i64} {
  func.func @_generator_loss_tile_kernel(%arg0: i32, %arg1: memref<32x256xf32, #tpu.memory_space<vmem>>, %arg2: memref<32x1xi32, #tpu.memory_space<vmem>>, %arg3: memref<1x1x128xf32, #tpu.memory_space<vmem>>) attributes {dimension_semantics = [#tpu.dimension_semantics<parallel>], iteration_bounds = array<i64: 3>, scalar_prefetch = 0 : i64, scratch_operands = 0 : i64, tpu.core_type = #tpu.core_type<tc>, window_params = [{transform_indices = @transform_0, window_bounds = array<i64: 32, 256>}, {transform_indices = @transform_1, window_bounds = array<i64: 32, 1>}, {transform_indices = @transform_2, window_bounds = array<i64: 1, 1, 128>}]} {
    %c0 = arith.constant 0 : index
    %c0_0 = arith.constant 0 : index
    %0 = vector.load %arg1[%c0, %c0_0] : memref<32x256xf32, #tpu.memory_space<vmem>>, vector<32x256xf32>
    %c0_1 = arith.constant 0 : index
    %c0_2 = arith.constant 0 : index
    %1 = vector.load %arg2[%c0_1, %c0_2] : memref<32x1xi32, #tpu.memory_space<vmem>>, vector<32x1xi32>
    %c0_i32 = arith.constant 0 : i32
    %2 = vector.broadcast %c0_i32 : i32 to vector<32x1xi32>
    %3 = arith.cmpi sge, %1, %2 : vector<32x1xi32>
    %c200_i32 = arith.constant 200 : i32
    %4 = vector.broadcast %c200_i32 : i32 to vector<32x1xi32>
    %5 = arith.cmpi slt, %1, %4 : vector<32x1xi32>
    %6 = arith.andi %3, %5 : vector<32x1xi1>
    %cst = arith.constant dense<0xFF800000> : vector<32xf32>
    %7 = vector.multi_reduction <maximumf>, %0, %cst [1] : vector<32x256xf32> to vector<32xf32>
    %8 = vector.shape_cast %7 : vector<32xf32> to vector<32x1xf32>
    %9 = vector.broadcast %8 : vector<32x1xf32> to vector<32x256xf32>
    %10 = arith.subf %0, %9 : vector<32x256xf32>
    %11 = math.exp %10 : vector<32x256xf32>
    %cst_3 = arith.constant dense<0.000000e+00> : vector<32xf32>
    %12 = vector.multi_reduction <add>, %11, %cst_3 [1] : vector<32x256xf32> to vector<32xf32>
    %13 = vector.shape_cast %12 : vector<32xf32> to vector<32x1xf32>
    %14 = math.log %13 : vector<32x1xf32>
    %15 = tpu.iota {dimensions = array<i32: 1>} : vector<32x256xi32>
    %16 = vector.broadcast %1 : vector<32x1xi32> to vector<32x256xi32>
    %17 = arith.cmpi eq, %15, %16 : vector<32x256xi32>
    %cst_4 = arith.constant 0.000000e+00 : f32
    %18 = vector.broadcast %cst_4 : f32 to vector<32x256xf32>
    %19 = arith.select %17, %0, %18 : vector<32x256xi1>, vector<32x256xf32>
    %cst_5 = arith.constant dense<0.000000e+00> : vector<32xf32>
    %20 = vector.multi_reduction <add>, %19, %cst_5 [1] : vector<32x256xf32> to vector<32xf32>
    %21 = vector.shape_cast %20 : vector<32xf32> to vector<32x1xf32>
    %22 = arith.addf %8, %14 : vector<32x1xf32>
    %23 = arith.subf %22, %21 : vector<32x1xf32>
    %cst_6 = arith.constant 0.000000e+00 : f32
    %24 = vector.broadcast %cst_6 : f32 to vector<32x1xf32>
    %25 = arith.select %6, %23, %24 : vector<32x1xi1>, vector<32x1xf32>
    %26 = vector.shape_cast %25 : vector<32x1xf32> to vector<1x32x1xf32>
    %cst_7 = arith.constant dense<0.000000e+00> : vector<1xf32>
    %27 = vector.multi_reduction <add>, %26, %cst_7 [1, 2] : vector<1x32x1xf32> to vector<1xf32>
    %28 = vector.shape_cast %27 : vector<1xf32> to vector<1x1x1xf32>
    %29 = vector.extract %28[0, 0, 0] : f32 from vector<1x1x1xf32>
    %cst_8 = arith.constant 0.000000e+00 : f32
    %30 = vector.broadcast %cst_8 : f32 to vector<1x1x128xf32>
    %31 = vector.broadcast %29 : f32 to vector<1x1x128xf32>
    %32 = arith.addf %30, %31 : vector<1x1x128xf32>
    %c0_9 = arith.constant 0 : index
    %c0_10 = arith.constant 0 : index
    %c0_11 = arith.constant 0 : index
    %33 = vector.load %arg3[%c0_9, %c0_10, %c0_11] : memref<1x1x128xf32, #tpu.memory_space<vmem>>, vector<1x1x128xf32>
    tpu.vector_store %arg3[%c0_9, %c0_10, %c0_11], %32 {strides = array<i32>} : memref<1x1x128xf32, #tpu.memory_space<vmem>>, vector<1x1x128xf32>,
    return
  }
  func.func @transform_0(%arg0: i32) -> (i32, i32) {
    %c0_i32 = arith.constant 0 : i32
    %c0_i32_0 = arith.constant 0 : i32
    return %arg0, %c0_i32 : i32, i32
  }
  func.func @transform_1(%arg0: i32) -> (i32, i32) {
    %c0_i32 = arith.constant 0 : i32
    %c0_i32_0 = arith.constant 0 : i32
    return %arg0, %c0_i32 : i32, i32
  }
  func.func @transform_2(%arg0: i32) -> (i32, i32, i32) {
    %c0_i32 = arith.constant 0 : i32
    %c0_i32_0 = arith.constant 0 : i32
    %c0_i32_1 = arith.constant 0 : i32
    return %arg0, %c0_i32, %c0_i32_0 : i32, i32, i32
  }
}

</mosaic_0001>

<bundles_post_ra>
// kernel: tpu_custom_call.1
= control target key start
LH: loop header
LB: loop body
LE: loop exit
PB: predicated region body
PF: predicated region fallthrough
CT: control target
= control target key end

     0   :  { %7 = vsyncpa [#allocation3], 0  ;;  %s887_s0 = inlined_call_operand.hbm [shape: f32[96,256], index: 0, kind: input, shape index: {}]   ;;  %s888_s1 = inlined_call_operand.vmem [shape: s32[96,1], index: 1, kind: input, shape index: {}]   ;;  %s889_s2 = inlined_call_operand.hbm [shape: f32[3,1,128], index: 2, kind: output, shape index: {}]  }
   0x1   :  { %9 = vsyncpa [#allocation3 + $0x1], 0 }
   0x2   :  { %10 = vsyncpa [#allocation4], 0 }
   0x3   :  { %12 = vsyncpa [#allocation4 + $0x1], 0  ;;  %s642_s9 = smov 0   ;;  %s644_s10 = smov 0  }
   0x4   :  { %s646_s11 = smov 0   ;;  %s648_s12 = smov 0  }
   0x5 LB: > { %s663_s13 = sadd.s32 4294967295, %s620_s12   ;;  %s431_s14 = sadd.s32 4294967294, %s620_s12   ;;  %s620_s12 = sphi %s648_s12, %s901_s12   ;;  %s616_s11 = sphi %s646_s11, %s900_s11   ;;  %s612_s10 = sphi %s644_s10, %s899_s10   ;;  %s608_s9 = sphi %s642_s9, %s898_s9  }
   0x6   : > { %s667_s15 = sadd.s32 1, %s620_s12   ;;  %s25_s16 = sadd.s32 1, %s616_s11 }
   0x7   : > { %s22_s17 = ssub.s32 %s620_s12, %s667_s15  ;;  %p32_p0 = scmp.ne.s32.totalorder %s616_s11, %s612_s10 }
   0x8   : > { %p23_p1 = scmp.eq.s32.totalorder %s22_s17, 0  ;;  %p33_p2 = scmp.eq.s32.totalorder %s620_s12, 0 }
   0x9   : > { %p38_p3 = scmp.ne.s32.totalorder %s612_s10, %s608_s9  ;;  %p39_p4 = scmp.eq.s32.totalorder %s663_s13, 0 }
   0xa   : > { %s679_s18 = scalar_select %p23_p1, %s616_s11, %s25_s16  }
   0xb   : > { %p681_p5 = por %p33_p2, %p32_p0  ;;  %p685_p6 = por %p39_p4, %p38_p3 }
   0xc   : > { %p88_p7 = scmp.eq.s32.totalorder %s663_s13, 2  ;;  %p94_p8 = scmp.eq.s32.totalorder %s431_s14, 2 }
   0xd   : > { %p461_p9 = scmp.lt.s32.totalorder %s620_s12, 3  ;;  %s114_s23 = sand.u32 1, %s616_s11  }
   0xe   : > { %p691_p10 = por %p88_p7, %p32_p0  ;;  %p695_p11 = por %p94_p8, %p38_p3 }
   0xf   : > { %s446_s24 = sshll.u32 %s620_s12, 10  ;;  %s434_s25 = sshll.u32 %s114_s23, 6 }
  0x10   : > { %s893_s21 = scalar_select %p691_p10, 1, 0 }
  0x11   : > { %s894_s22 = scalar_select %p695_p11, 1, 0 }
  0x12   : > { %s704_s28 = scalar_lea.hbm %s887_s0, %s446_s24  ;;  %s118_s29 = scalar_lea.vmem [#allocation2], %s434_s25 }
  0x13   : > { %s126_s30 = sshll.u32 %s118_s29, 4  ;;  %p708_p12 = pnand %p461_p9, %p681_p5  ;;  %s712_s30 = int_to_ptr.vmem [resolvable:$true] %s126_s30 }
  0x14   : > { %s714_s4 = scalar_lea.sflag [#allocation3], %s114_s23  ;;  %s524_s5 = scalar_lea.hbm %s704_s28, 1024 }
  0x15   : > { %p525_p13 = scmp.ne.s32.totalorder %s704_s28, %s524_s5  ;;  %p526_p0 = pneg %p708_p12 }
  0x16   : > { %s529_s8 = scalar_lea.hbm %s887_s0, 3072  ;;  %p530_p3 = scmp.lt.u32.totalorder %s704_s28, %s887_s0 }
  0x17   : > { %p527_p1 = pnand %p526_p0, %p525_p13  ;;  %p531_p4 = scmp.lt.u32.totalorder %s529_s8, %s524_s5 }
  0x18   : > { %p533_p7 = scmp.lt.u32.totalorder %s524_s5, %s704_s28 }
  0x19   : > { %p528_p2 = pneg %p527_p1  ;;  %p532_p5 = por %p531_p4, %p530_p3 }
  0x1b   : > { %p534_p8 = por %p533_p7, %p532_p5 }
  0x1d   : > { %p535_p9 = pnand %p534_p8, %p528_p2 }
  0x1f   : > { %538 = shalt.err (!%p535_p9)
}
  0x20   : > { %s539_s17 = scalar_lea.vmem %s712_s30, 1024  ;;  %s622_s19 = smov [#allocation2]  }
  0x21   : > { %p540_p13 = scmp.ne.s32.totalorder %s712_s30, %s539_s17  ;;  %s544_s23 = sshll.u32 %s622_s19, 4  ;;  %s545_s23 = int_to_ptr.vmem [resolvable:$false] %s544_s23 }
  0x22   : > { %s546_s24 = scalar_lea.vmem %s545_s23, 2048  ;;  %p547_p10 = scmp.lt.s32.totalorder %s712_s30, %s545_s23 }
  0x23   : > { %p542_p1 = pnand %p540_p13, %p526_p0  ;;  %p548_p3 = scmp.lt.s32.totalorder %s546_s24, %s539_s17 }
  0x25   : > { %p543_p11 = pneg %p542_p1  ;;  %p549_p4 = por %p548_p3, %p547_p10 }
  0x27   : > { %p550_p5 = pnand %p549_p4, %p543_p11 }
  0x29   : > { %553 = shalt.err (!%p550_p5)
}
  0x2a   : > { %s623_s25 = smov 256   ;;  %s624_s26 = smov 16  }
  0x2b   : > { %456 = dma.hbm_to_vmem [thread:$0]  (!%p708_p12), %s704_s28, 1024, %s712_s30, %s714_s4, %s623_s25, %s623_s25, %s624_s26  }
  0x2c   : > { %p438_p0 = scmp.ge.s32.totalorder %s620_s12, 1  ;;  %p143_p2 = scmp.lt.s32.totalorder %s620_s12, 4 }
  0x2e   : > { %p144_p7 = pnand %p438_p0, %p143_p2 }
  0x2f   : > { %s745_s27 = sand.u32 (!%p144_p7), 1, %s612_s10  }
  0x30   : > { %147 = sbr.rel (%p144_p7) target bundleno = 610 (0x262), region = 28  ;;  %s439_s29 = sshll.u32 (!%p144_p7), %s745_s27, 6 }
  0x31   : > { %s150_s5 = scalar_lea.sflag (!%p144_p7), [#allocation3], %s745_s27  ;;  %s153_s6 = scalar_lea.vmem (!%p144_p7), [#allocation2], %s439_s29 }
  0x37   : > { %599 = dma.done.wait (%p685_p6), %s150_s5, 1024  }
  0x38   : > { %601 = vsyncadd (%p685_p6), %s150_s5, 4294966272  ;;  %v625_v0 = vmov 0   ;;  %v753_v1 = vld [vmem:[%s153_s6] sm:$0xff]  ;;  %v755_v2 = vld [vmem:[%s153_s6 + $0x8] sm:$0xff]  ;;  %s440_s20 = sshll.u32 %s663_s13, 2  ;;  %v265_v35 = vlaneseq  ;;  %s177_s7 = scalar_lea.vmem [#allocation5], %s745_s27 }
  0x39   : > { %499 = vset.pattern.permute.xlu1 %v625_v0  ;;  %498 = vset.pattern.permute.xlu0 %v625_v0  ;;  %v757_v3 = vld [vmem:[%s153_s6 + $0x20] sm:$0xff]  ;;  %v209_v4 = vmax.f32 %v753_v1, %v755_v2  ;;  %v761_v5 = vld [vmem:[%s153_s6 + $0x28] sm:$0xff]  ;;  %v763_v6 = vld [vmem:[%s153_s6 + $0x10] sm:$0xff]  ;;  %p180_p6 = scmp.lt.s32.totalorder %s440_s20, 11  ;;  %s353_s8 = sshll.u32 %s177_s7, 4  ;;  %s841_s8 = int_to_ptr.vmem [resolvable:$true] %s353_s8 }
  0x3a   : > { %v765_v7 = vld [vmem:[%s153_s6 + $0x18] sm:$0xff]  ;;  %v215_v8 = vmax.f32 %v757_v3, %v761_v5  ;;  %v769_v9 = vld [vmem:[%s153_s6 + $0x30] sm:$0xff]  ;;  %v266_v39 = vand.u32 127, %v265_v35  ;;  %s442_s14 = sshll.u32 %s663_s13, 4  ;;  %s341_s24 = scalar_lea.sflag [#allocation4], %s745_s27 }
  0x3b   : > { %v771_v10 = vld [vmem:[%s153_s6 + $0x38] sm:$0xff]  ;;  %210 = vmax.xlane.f32.xlu0 %v209_v4  ;;  %v212_v11 = vmax.f32 %v763_v6, %v765_v7  ;;  %s903_s20 = smov (!%p180_p6, %s440_s20), 11  ;;  %s846_s23 = scalar_lea.hbm %s889_s2, %s442_s14 }
  0x3c   : > { %216 = vmax.xlane.f32.xlu1 %v215_v8  ;;  %v218_v12 = vmax.f32 %v769_v9, %v771_v10  ;;  %s441_s28 = sshll.u32 %s903_s20, 3  ;;  %v267_v41 = vadd.s32 128, %v266_v39  ;;  %s554_s25 = scalar_lea.vmem %s841_s8, 16 }
  0x3d   : > { %s183_s4 = scalar_lea.vmem %s888_s1, %s441_s28  ;;  %p555_p10 = scmp.ne.s32.totalorder %s841_s8, %s554_s25 }
  0x3e   : > { %v781_v13 = vld [vmem:[%s183_s4 + $0x8] sm:$0xff]  ;;  %v784_v14 = vld [vmem:[%s183_s4 + $0x10] sm:$0xff]  ;;  %v786_v15 = vld [vmem:[%s183_s4] sm:$0xff]  ;;  %p896_p11 = scmp.ne.s32.totalorder %s893_s21, 0  ;;  %s626_s13 = smov [#allocation5]  }
  0x3f   : > { %213 = vmax.xlane.f32.xlu0 %v212_v11  ;;  %v790_v16 = vld [vmem:[%s183_s4 + $0x18] sm:$0xff]  ;;  %vm197_vm8 = vcmp.ge.s32.totalorder %v786_v15, 0  ;;  %vm201_vm9 = vcmp.lt.s32.totalorder %v786_v15, 200  ;;  %vm199_vm10 = vcmp.ge.s32.totalorder %v784_v14, 0  ;;  %vm203_vm11 = vcmp.lt.s32.totalorder %v784_v14, 200  ;;  %s558_s26 = sshll.u32 %s626_s13, 4  ;;  %s559_s26 = int_to_ptr.vmem [resolvable:$false] %s558_s26 }
  0x40   : > { %219 = vmax.xlane.f32.xlu1 %v218_v12  ;;  %vm198_vm12 = vcmp.ge.s32.totalorder %v781_v13, 0  ;;  %vm202_vm13 = vcmp.lt.s32.totalorder %v781_v13, 200  ;;  %vm205_vm14 = vmand %vm197_vm8, %vm201_vm9  ;;  %p556_p12 = pnand %p555_p10, %p896_p11  ;;  %s560_s29 = scalar_lea.vmem %s559_s26, 32 }
  0x41   : > { %vm207_vm15 = vmand %vm199_vm10, %vm203_vm11  ;;  %p561_p9 = scmp.lt.s32.totalorder %s841_s8, %s559_s26  ;;  %p562_p13 = scmp.lt.s32.totalorder %s560_s29, %s554_s25 }
  0x42   : > { %p557_p8 = pneg %p556_p12 }
  0x43   : > { %p563_p1 = por %p562_p13, %p561_p9 }
  0x45   : > { %p564_p3 = pnand %p563_p1, %p557_p8 }
  0x51   : > { %272 = vperm.xlu1 %499, %v781_v13  }
  0x55   : > { %275 = vperm.xlu1 %499, %v784_v14   ;;  %269 = vperm.xlu0 %498, %v786_v15  }
  0x59   : > { %278 = vperm.xlu1 %499, %v790_v16  }
  0xc8   : > { %v793_v17 = vpop.xlane.xlu0 %210 }
  0xc9   : > { %v221_v18 = vsub.f32 %v753_v1, %v793_v17  ;;  %v222_v19 = vsub.f32 %v755_v2, %v793_v17  ;;  %v799_v20 = vpop.xlane.xlu1 %216 }
  0xca   : > { %v225_v21 = vsub.f32 %v757_v3, %v799_v20  ;;  %v226_v22 = vsub.f32 %v761_v5, %v799_v20 }
  0xcb   : > { %v229_v23 = vmul.f32 1.442695, %v221_v18  ;;  %v231_v24 = vmul.f32 1.442695, %v222_v19 }
  0xcc   : > { %v237_v25 = vmul.f32 1.442695, %v225_v21  ;;  %v239_v26 = vmul.f32 1.442695, %v226_v22  ;;  %v805_v27 = vpop.xlane.xlu0 %213 }
  0xcd   : > { %500 = vpow2.f32 %v229_v23  ;;  %v223_v28 = vsub.f32 %v763_v6, %v805_v27  ;;  %v224_v29 = vsub.f32 %v765_v7, %v805_v27  ;;  %v811_v30 = vpop.xlane.xlu1 %219 }
  0xce   : > { %502 = vpow2.f32 %v231_v24  ;;  %v227_v31 = vsub.f32 %v769_v9, %v811_v30  ;;  %v228_v32 = vsub.f32 %v771_v10, %v811_v30 }
  0xcf   : > { %504 = vpow2.f32 %v237_v25  ;;  %v233_v33 = vmul.f32 1.442695, %v223_v28  ;;  %v235_v34 = vmul.f32 1.442695, %v224_v29 }
  0xd0   : > { %506 = vpow2.f32 %v239_v26  ;;  %v241_v36 = vmul.f32 1.442695, %v227_v31  ;;  %v243_v37 = vmul.f32 1.442695, %v228_v32 }
  0xd1   : > { %508 = vpow2.f32 %v233_v33  ;;  %v273_v38 = vpop.permute.xlu1 %272 }
  0xd2   : > { %510 = vpow2.f32 %v235_v34  ;;  %vm282_vm4 = vcmp.eq.s32.totalorder %v266_v39, %v273_v38  ;;  %vm283_vm5 = vcmp.eq.s32.totalorder %v267_v41, %v273_v38 }
  0xd3   : > { %512 = vpow2.f32 %v241_v36  ;;  %v290_v62 = vsel %vm282_vm4, %v763_v6, 0.0  ;;  %v291_v63 = vsel %vm283_vm5, %v765_v7, 0.0 }
  0xd4   : > { %514 = vpow2.f32 %v243_v37  ;;  %v270_v47 = vpop.permute.xlu0 %269  ;;  %v299_v0 = vadd.f32 %v291_v63, %v290_v62 }
  0xd5   : > { %v276_v43 = vpop.permute.xlu1 %275  ;;  %vm280_vm2 = vcmp.eq.s32.totalorder %v266_v39, %v270_v47  ;;  %vm281_vm3 = vcmp.eq.s32.totalorder %v267_v41, %v270_v47 }
  0xd6   : > { %vm284_vm0 = vcmp.eq.s32.totalorder %v266_v39, %v276_v43  ;;  %vm285_vm1 = vcmp.eq.s32.totalorder %v267_v41, %v276_v43  ;;  %v288_v58 = vsel %vm280_vm2, %v753_v1, 0.0  ;;  %v289_v59 = vsel %vm281_vm3, %v755_v2, 0.0  ;;  %vm206_vm2 = vmand %vm198_vm12, %vm202_vm13 }
  0xd7   : > { %v501_v40 = vpop.eup %500  ;;  %v292_v51 = vsel %vm284_vm0, %v757_v3, 0.0  ;;  %v293_v52 = vsel %vm285_vm1, %v761_v5, 0.0  ;;  %v296_v60 = vadd.f32 %v289_v59, %v288_v58  ;;  %vm200_vm0 = vcmp.ge.s32.totalorder %v790_v16, 0 }
  0xd8   : > { %v503_v42 = vpop.eup %502  ;;  %v302_v57 = vadd.f32 %v293_v52, %v292_v51  ;;  %vm204_vm1 = vcmp.lt.s32.totalorder %v790_v16, 200  ;;  %vm320_vm3 = vcmask 7168  }
  0xd9   : > { %v505_v44 = vpop.eup %504  ;;  %v245_v45 = vadd.f32 %v503_v42, %v501_v40  ;;  %v279_v61 = vpop.permute.xlu1 %278  ;;  %vm208_vm4 = vmand %vm200_vm0, %vm204_vm1 }
  0xda   : > { %v507_v46 = vpop.eup %506  ;;  %vm286_vm6 = vcmp.eq.s32.totalorder %v266_v39, %v279_v61  ;;  %vm287_vm7 = vcmp.eq.s32.totalorder %v267_v41, %v279_v61 }
  0xdb   : > { %v509_v48 = vpop.eup %508  ;;  %246 = vadd.xlane.f32.xlu1 %v245_v45  ;;  %v251_v49 = vadd.f32 %v507_v46, %v505_v44  ;;  %v294_v3 = vsel %vm286_vm6, %v769_v9, 0.0  ;;  %v295_v1 = vsel %vm287_vm7, %v771_v10, 0.0 }
  0xdc   : > { %v511_v50 = vpop.eup %510  ;;  %v305_v2 = vadd.f32 %v295_v1, %v294_v3 }
  0xdd   : > { %v513_v53 = vpop.eup %512  ;;  %v248_v54 = vadd.f32 %v511_v50, %v509_v48 }
  0xde   : > { %v515_v55 = vpop.eup %514 }
  0xdf   : > { %252 = vadd.xlane.f32.xlu1 %v251_v49  ;;  %249 = vadd.xlane.f32.xlu0 %v248_v54  ;;  %v254_v56 = vadd.f32 %v515_v55, %v513_v53 }
  0xe3   : > { %255 = vadd.xlane.f32.xlu1 %v254_v56  ;;  %303 = vadd.xlane.f32.xlu0 %v302_v57 }
  0xe7   : > { %297 = vadd.xlane.f32.xlu1 %v296_v60 }
  0xeb   : > { %300 = vadd.xlane.f32.xlu1 %v299_v0 }
  0xef   : > { %306 = vadd.xlane.f32.xlu1 %v305_v2 }
 0x168   : > { %v247_v4 = vpop.xlane.xlu1 %246 }
 0x169   : > { %516 = vlog2.f32 %v247_v4 }
 0x16c   : > { %v253_v5 = vpop.xlane.xlu1 %252  ;;  %v250_v8 = vpop.xlane.xlu0 %249 }
 0x16d   : > { %518 = vlog2.f32 %v253_v5 }
 0x16e   : > { %520 = vlog2.f32 %v250_v8 }
 0x170   : > { %v256_v6 = vpop.xlane.xlu1 %255  ;;  %v304_v25 = vpop.xlane.xlu0 %303 }
 0x171   : > { %522 = vlog2.f32 %v256_v6 }
 0x173   : > { %v517_v7 = vpop.eup %516 }
 0x174   : > { %v258_v11 = vmul.f32 0.6931472, %v517_v7  ;;  %v298_v12 = vpop.xlane.xlu1 %297 }
 0x176   : > { %v308_v18 = vadd.f32 %v258_v11, %v793_v17 }
 0x177   : > { %v519_v19 = vpop.eup %518 }
 0x178   : > { %v521_v9 = vpop.eup %520  ;;  %v262_v10 = vmul.f32 0.6931472, %v519_v19  ;;  %v312_v22 = vsub.f32 %v308_v18, %v298_v12  ;;  %v301_v23 = vpop.xlane.xlu1 %300 }
 0x179   : > { %v260_v21 = vmul.f32 0.6931472, %v521_v9 }
 0x17a   : > { %v310_v17 = vadd.f32 %v262_v10, %v799_v20  ;;  %v316_v28 = vsel %vm205_vm14, %v312_v22, 0.0 }
 0x17b   : > { %v523_v24 = vpop.eup %522  ;;  %v309_v15 = vadd.f32 %v260_v21, %v805_v27  ;;  %v321_v34 = vsel %vm320_vm3, %v316_v28, 0.0 }
 0x17c   : > { %v264_v14 = vmul.f32 0.6931472, %v523_v24  ;;  %v314_v26 = vsub.f32 %v310_v17, %v304_v25  ;;  %v307_v33 = vpop.xlane.xlu1 %306 }
 0x17d   : > { %v313_v29 = vsub.f32 %v309_v15, %v301_v23 }
 0x17e   : > { %v311_v31 = vadd.f32 %v264_v14, %v811_v30  ;;  %v318_v20 = vsel %vm207_vm15, %v314_v26, 0.0 }
 0x17f   : > { %v317_v32 = vsel %vm206_vm2, %v313_v29, 0.0  ;;  %v324_v16 = vsel %vm320_vm3, %v318_v20, 0.0 }
 0x180   : > { %v322_v27 = vsel %vm320_vm3, %v317_v32, 0.0  ;;  %v315_v35 = vsub.f32 %v311_v31, %v307_v33 }
 0x181   : > { %v323_v36 = vadd.f32 %v322_v27, %v321_v34 }
 0x182   : > { %v319_v37 = vsel %vm208_vm4, %v315_v35, 0.0 }
 0x183   : > { %v325_v38 = vadd.f32 %v324_v16, %v323_v36  ;;  %v326_v13 = vsel %vm320_vm3, %v319_v37, 0.0 }
 0x185   : > { %v327_v39 = vadd.f32 %v326_v13, %v325_v38 }
 0x187   : > { %328 = vadd.xlane.f32.xlu0 %v327_v39 }
 0x214   : > { %v329_v40 = vpop.xlane.xlu0 %328 }
 0x215   : > { %v330_v41 = vrot.slane %v329_v40, 4 }
 0x217   : > { %v331_v30 = vadd.f32 %v330_v41, %v329_v40 }
 0x219   : > { %v332_v42 = vrot.slane %v331_v30, 2 }
 0x21b   : > { %v333_v43 = vadd.f32 %v332_v42, %v331_v30 }
 0x21d   : > { %v334_v44 = vrot.slane %v333_v43, 1 }
 0x21f   : > { %v335_v45 = vadd.f32 %v334_v44, %v333_v43 }
 0x221   : > { %447 = vpush %v335_v45 }
 0x252   : > { %s448_s16 = spop %447 }
 0x253   : > { %v337_v46 = vstv %s448_s16 }
 0x254   : > { %339 = vst [vmem:[%s177_s7] sm:$0x1] %v337_v46 }
 0x255   : > { %567 = shalt.err (!%p564_p3)
}
 0x256   : > { %s568_s27 = scalar_lea.hbm %s846_s23, 16  ;;  %s572_s20 = scalar_lea.hbm %s889_s2, 48 }
 0x257   : > { %p569_p4 = scmp.ne.s32.totalorder %s846_s23, %s568_s27  ;;  %p573_p2 = scmp.lt.u32.totalorder %s846_s23, %s889_s2 }
 0x258   : > { %p574_p7 = scmp.lt.u32.totalorder %s572_s20, %s568_s27  ;;  %p576_p10 = scmp.lt.u32.totalorder %s568_s27, %s846_s23 }
 0x259   : > { %p570_p5 = pnand %p569_p4, %p896_p11 }
 0x25a   : > { %p575_p6 = por %p574_p7, %p573_p2 }
 0x25b   : > { %p571_p0 = pneg %p570_p5 }
 0x25c   : > { %p577_p12 = por %p576_p10, %p575_p6 }
 0x25e   : > { %p578_p8 = pnand %p577_p12, %p571_p0 }
 0x260   : > { %581 = shalt.err (!%p578_p8)
}
 0x261   : > { %451 = dma.vmem_to_hbm [thread:$0]  (%p896_p11), %s841_s8, 16, %s846_s23, %s341_s24  }
 0x262 PF: > { %p462_p9 = scmp.ge.s32.totalorder %s620_s12, 2  ;;  %s365_s3 = sand.u32 1, %s608_s9  }
 0x263   : > { %p897_p13 = scmp.ne.s32.totalorder %s894_s22, 0  ;;  %s366_s4 = scalar_lea.sflag [#allocation4], %s365_s3 }
 0x265   : > { %p458_p1 = pnand %p462_p9, %p897_p13 }
 0x267   : > { %603 = dma.done.wait (!%p458_p1), %s366_s4, 16  }
 0x268   : > { %605 = vsyncadd (!%p458_p1), %s366_s4, 4294967280  ;;  %p15_p3 = scmp.ge.s32.totalorder %s667_s15, 5   ;;  %s898_s9 = smov %s612_s10 }
 0x269   : > { %s899_s10 = smov %s616_s11  ;;  %s900_s11 = smov %s679_s18 }
 0x26a   : > { %s901_s12 = smov %s667_s15  ;;  %17 = sbr.rel (!%p15_p3) target bundleno = 5 (0x5), region = 76 }
 0x271   :  { %370 = vsyncpa [#allocation3], 1 }
 0x272   :  { %372 = vsyncpa [#allocation3 + $0x1], 1 }
 0x273   :  { %373 = vsyncpa [#allocation4], 1 }
 0x274   :  { %375 = vsyncpa [#allocation4 + $0x1], 1 }

</bundles_post_ra>
